<compile_context>
chip_gen: v7x
topology: tpu7x:2x2x1
jax: 0.10.0
libtpu: 0.0.40
codegen_flags: <defaults>
</compile_context>

<pallas_src>
import math

import jax
import jax.numpy as jnp
from jax import lax
from jax.experimental import pallas as pl
from jax.experimental.pallas import tpu as pltpu


# ---------------------------------------------------------------------------
# Stage 1: encoder MLPs (E1(x), E2(y)), tiled over the batch dimension.
# ---------------------------------------------------------------------------
def _encoder_kernel(x_ref, y_ref,
                    w1x_ref, b1x_ref, w2x_ref, b2x_ref,
                    w1y_ref, b1y_ref, w2y_ref, b2y_ref,
                    ex_ref, ey_ref):
    # E1(x): Linear -> ReLU -> Linear.  bf16 MXU operands, f32 accumulation;
    # bias add / ReLU stay in f32.
    hx = jnp.dot(x_ref[...].astype(jnp.bfloat16), w1x_ref[...],
                 preferred_element_type=jnp.float32) + b1x_ref[...]
    hx = jnp.maximum(hx, 0.0)
    ex = jnp.dot(hx.astype(jnp.bfloat16), w2x_ref[...],
                 preferred_element_type=jnp.float32) + b2x_ref[...]
    ex_ref[...] = ex.astype(ex_ref.dtype)

    # E2(y): Linear -> ReLU -> Linear.  (1/sqrt(enc_dim) already folded into
    # w2y/b2y at parameter-prep time.)
    hy = jnp.dot(y_ref[...].astype(jnp.bfloat16), w1y_ref[...],
                 preferred_element_type=jnp.float32) + b1y_ref[...]
    hy = jnp.maximum(hy, 0.0)
    ey = jnp.dot(hy.astype(jnp.bfloat16), w2y_ref[...],
                 preferred_element_type=jnp.float32) + b2y_ref[...]
    ey_ref[...] = ey.astype(ey_ref.dtype)


# ---------------------------------------------------------------------------
# Stage 2: B x B scaled score matrix on a 2-D tile grid; diagonal masking only
# on diagonal tiles.  Two outputs: joint (diag) and marginal (off-diag).
# ---------------------------------------------------------------------------
def _score_kernel(ex_ref, ey_ref, joint_ref, marg_ref):
    i = pl.program_id(0)
    j = pl.program_id(1)

    # Contract over enc_dim of both operands directly — no materialized ey.T.
    score = lax.dot_general(
        ex_ref[...], ey_ref[...],
        dimension_numbers=(((1,), (1,)), ((), ())),
        preferred_element_type=jnp.float32)

    @pl.when(i == j)
    def _diag_tile():
        row = lax.broadcasted_iota(jnp.int32, score.shape, 0)
        col = lax.broadcasted_iota(jnp.int32, score.shape, 1)
        on_diag = row == col
        joint_ref[...] = jnp.where(on_diag, score, 0.0)
        marg_ref[...] = jnp.where(on_diag, 0.0, score)

    @pl.when(i != j)
    def _off_diag_tile():
        joint_ref[...] = jnp.zeros_like(score)
        marg_ref[...] = score


# ---------------------------------------------------------------------------
# One-time parameter preparation (done once, outside the hot path).
# ---------------------------------------------------------------------------
def prepare_critic_params(params, *, scale=True):
    """Fold 1/sqrt(enc_dim) into the last y-encoder layer and cast weights to
    bf16 (MXU operands); biases stay f32 (VPU adds)."""
    enc_dim = params["w2y"].shape[-1]
    factor = 1.0 / math.sqrt(enc_dim) if scale else 1.0
    scaled = dict(params)
    scaled["w2y"] = params["w2y"] * factor
    scaled["b2y"] = params["b2y"] * factor
    prepared = {}
    for k, v in scaled.items():
        prepared[k] = v.astype(jnp.bfloat16) if k.startswith("w") else v.astype(jnp.float32)
    return prepared


# ---------------------------------------------------------------------------
# Wrapper: two pallas_calls (encoders, then tiled score matrix).
# ---------------------------------------------------------------------------
def dot_product_critic(x, y, prepared_params, *, batch_tile=256, score_tile=256):
    bsz, dim_x = x.shape
    _, dim_y = y.shape
    p = prepared_params
    hidden = p["w1x"].shape[-1]
    enc_dim = p["w2x"].shape[-1]

    tm_enc = min(batch_tile, bsz)
    ts = min(score_tile, bsz)
    assert bsz % tm_enc == 0 and bsz % ts == 0, "batch must be divisible by the tile sizes"

    weight_keys = ("w1x", "b1x", "w2x", "b2x", "w1y", "b1y", "w2y", "b2y")
    # Whole-array (block == full shape) VMEM residency; constant block index
    # across the grid so the copy is not re-issued per step.
    weight_specs = [pl.BlockSpec(p[k].shape, lambda i: (0, 0)) for k in weight_keys]

    param_bytes = sum(int(p[k].size) * p[k].dtype.itemsize for k in weight_keys)

    # ---- stage 1: encoders ------------------------------------------------
    enc_cost = pl.CostEstimate(
        flops=2 * bsz * (dim_x * hidden + hidden * enc_dim)
              + 2 * bsz * (dim_y * hidden + hidden * enc_dim),
        transcendentals=0,
        bytes_accessed=int(x.size) * x.dtype.itemsize
                       + int(y.size) * y.dtype.itemsize
                       + param_bytes
                       + 2 * bsz * enc_dim * 2)
    ex, ey = pl.pallas_call(
        _encoder_kernel,
        out_shape=(jax.ShapeDtypeStruct((bsz, enc_dim), jnp.bfloat16),
                   jax.ShapeDtypeStruct((bsz, enc_dim), jnp.bfloat16)),
        grid=(bsz // tm_enc,),
        in_specs=[pl.BlockSpec((tm_enc, dim_x), lambda i: (i, 0)),
                  pl.BlockSpec((tm_enc, dim_y), lambda i: (i, 0))] + weight_specs,
        out_specs=(pl.BlockSpec((tm_enc, enc_dim), lambda i: (i, 0)),
                   pl.BlockSpec((tm_enc, enc_dim), lambda i: (i, 0))),
        compiler_params=pltpu.CompilerParams(dimension_semantics=("parallel",)),
        cost_estimate=enc_cost,
    )(x, y, *[p[k] for k in weight_keys])

    # ---- stage 2: tiled score matrix --------------------------------------
    score_cost = pl.CostEstimate(
        flops=2 * bsz * bsz * enc_dim,
        transcendentals=0,
        bytes_accessed=2 * bsz * enc_dim * 2 + 2 * bsz * bsz * 4)
    joint, marginal = pl.pallas_call(
        _score_kernel,
        out_shape=(jax.ShapeDtypeStruct((bsz, bsz), jnp.float32),
                   jax.ShapeDtypeStruct((bsz, bsz), jnp.float32)),
        grid=(bsz // ts, bsz // ts),
        in_specs=[pl.BlockSpec((ts, enc_dim), lambda i, j: (i, 0)),
                  pl.BlockSpec((ts, enc_dim), lambda i, j: (j, 0))],
        out_specs=(pl.BlockSpec((ts, ts), lambda i, j: (i, j)),
                   pl.BlockSpec((ts, ts), lambda i, j: (i, j))),
        compiler_params=pltpu.CompilerParams(
            dimension_semantics=("parallel", "parallel")),
        cost_estimate=score_cost,
    )(ex, ey)

    return joint, marginal


# ---------------------------------------------------------------------------
# Pure-JAX f32 reference (matches the torch module's semantics).
# ---------------------------------------------------------------------------
def _reference(x, y, params, *, scale=True):
    hx = jnp.maximum(x @ params["w1x"] + params["b1x"], 0.0)
    ex = hx @ params["w2x"] + params["b2x"]
    hy = jnp.maximum(y @ params["w1y"] + params["b1y"], 0.0)
    ey = hy @ params["w2y"] + params["b2y"]
    factor = 1.0 / math.sqrt(ex.shape[-1]) if scale else 1.0
    score = (ex @ ey.T) * factor
    mask = jnp.eye(ex.shape[0], dtype=score.dtype)
    return score * mask, score * (1.0 - mask)


def _init_params(key, dim_x, dim_y, hidden, enc_dim):
    ks = jax.random.split(key, 8)

    def lin(kw, kb, fan_in, fan_out):
        bound = 1.0 / math.sqrt(fan_in)
        w = jax.random.uniform(kw, (fan_in, fan_out), jnp.float32, -bound, bound)
        b = jax.random.uniform(kb, (1, fan_out), jnp.float32, -bound, bound)
        return w, b

    w1x, b1x = lin(ks[0], ks[1], dim_x, hidden)
    w2x, b2x = lin(ks[2], ks[3], hidden, enc_dim)
    w1y, b1y = lin(ks[4], ks[5], dim_y, hidden)
    w2y, b2y = lin(ks[6], ks[7], hidden, enc_dim)
    return dict(w1x=w1x, b1x=b1x, w2x=w2x, b2x=b2x,
                w1y=w1y, b1y=b1y, w2y=w2y, b2y=b2y)


if __name__ == "__main__":
    key = jax.random.PRNGKey(0)
    k_params, k_x, k_y = jax.random.split(key, 3)

    batch, dim_x, dim_y, hidden, enc_dim = 8, 32, 16, 32, 32
    params = _init_params(k_params, dim_x, dim_y, hidden, enc_dim)
    x = jax.random.normal(k_x, (batch, dim_x), jnp.float32)
    y = jax.random.normal(k_y, (batch, dim_y), jnp.float32)

    prepared = prepare_critic_params(params, scale=True)

    joint, marginal = dot_product_critic(x, y, prepared)
    joint = jax.block_until_ready(joint)
    marginal = jax.block_until_ready(marginal)

    ref_joint, ref_marginal = _reference(x, y, params, scale=True)
    # bf16 MXU operands (f32 accumulation) -> loosened tolerance vs f32 reference.
    assert jnp.allclose(joint, ref_joint, atol=5e-2, rtol=5e-2)
    assert jnp.allclose(marginal, ref_marginal, atol=5e-2, rtol=5e-2)

    print("KERNEL_OK")
</pallas_src>

<mosaic_0001>
module attributes {stable_mosaic.version = 11 : i64} {
  func.func @_encoder_kernel(%arg0: i32, %arg1: memref<8x32xf32, #tpu.memory_space<vmem>>, %arg2: memref<8x16xf32, #tpu.memory_space<vmem>>, %arg3: memref<32x32xbf16, #tpu.memory_space<vmem>>, %arg4: memref<1x32xf32, #tpu.memory_space<vmem>>, %arg5: memref<32x32xbf16, #tpu.memory_space<vmem>>, %arg6: memref<1x32xf32, #tpu.memory_space<vmem>>, %arg7: memref<16x32xbf16, #tpu.memory_space<vmem>>, %arg8: memref<1x32xf32, #tpu.memory_space<vmem>>, %arg9: memref<32x32xbf16, #tpu.memory_space<vmem>>, %arg10: memref<1x32xf32, #tpu.memory_space<vmem>>, %arg11: memref<8x32xbf16, #tpu.memory_space<vmem>>, %arg12: memref<8x32xbf16, #tpu.memory_space<vmem>>) attributes {dimension_semantics = [#tpu.dimension_semantics<parallel>], iteration_bounds = array<i64: 1>, scalar_prefetch = 0 : i64, scratch_operands = 0 : i64, tpu.core_type = #tpu.core_type<tc>, window_params = [{transform_indices = @transform_0, window_bounds = array<i64: 8, 32>}, {transform_indices = @transform_1, window_bounds = array<i64: 8, 16>}, {pipeline_mode = #tpu.pipeline_mode<synchronous>, transform_indices = @transform_2, window_bounds = array<i64: 32, 32>}, {pipeline_mode = #tpu.pipeline_mode<synchronous>, transform_indices = @transform_3, window_bounds = array<i64: 1, 32>}, {pipeline_mode = #tpu.pipeline_mode<synchronous>, transform_indices = @transform_4, window_bounds = array<i64: 32, 32>}, {pipeline_mode = #tpu.pipeline_mode<synchronous>, transform_indices = @transform_5, window_bounds = array<i64: 1, 32>}, {pipeline_mode = #tpu.pipeline_mode<synchronous>, transform_indices = @transform_6, window_bounds = array<i64: 16, 32>}, {pipeline_mode = #tpu.pipeline_mode<synchronous>, transform_indices = @transform_7, window_bounds = array<i64: 1, 32>}, {pipeline_mode = #tpu.pipeline_mode<synchronous>, transform_indices = @transform_8, window_bounds = array<i64: 32, 32>}, {pipeline_mode = #tpu.pipeline_mode<synchronous>, transform_indices = @transform_9, window_bounds = array<i64: 1, 32>}, {transform_indices = @transform_10, window_bounds = array<i64: 8, 32>}, {transform_indices = @transform_11, window_bounds = array<i64: 8, 32>}]} {
    %c0 = arith.constant 0 : index
    %c0_0 = arith.constant 0 : index
    %0 = vector.load %arg1[%c0, %c0_0] : memref<8x32xf32, #tpu.memory_space<vmem>>, vector<8x32xf32>
    %1 = arith.truncf %0 : vector<8x32xf32> to vector<8x32xbf16>
    %c0_1 = arith.constant 0 : index
    %c0_2 = arith.constant 0 : index
    %2 = vector.load %arg3[%c0_1, %c0_2] : memref<32x32xbf16, #tpu.memory_space<vmem>>, vector<32x32xbf16>
    %cst = arith.constant dense<0.000000e+00> : vector<8x32xf32>
    %3 = tpu.matmul %1, %2, %cst {dimension_numbers = #tpu.dot_dimension_numbers<[1], [0], [0], [1], [0, 0, 1, 1], [], []>} : vector<8x32xbf16>, vector<32x32xbf16>, vector<8x32xf32> -> vector<8x32xf32>
    %c0_3 = arith.constant 0 : index
    %c0_4 = arith.constant 0 : index
    %4 = vector.load %arg4[%c0_3, %c0_4] : memref<1x32xf32, #tpu.memory_space<vmem>>, vector<1x32xf32>
    %5 = vector.broadcast %4 : vector<1x32xf32> to vector<8x32xf32>
    %6 = arith.addf %3, %5 : vector<8x32xf32>
    %cst_5 = arith.constant 0.000000e+00 : f32
    %7 = vector.broadcast %cst_5 : f32 to vector<8x32xf32>
    %8 = arith.maximumf %6, %7 : vector<8x32xf32>
    %9 = arith.truncf %8 : vector<8x32xf32> to vector<8x32xbf16>
    %c0_6 = arith.constant 0 : index
    %c0_7 = arith.constant 0 : index
    %10 = vector.load %arg5[%c0_6, %c0_7] : memref<32x32xbf16, #tpu.memory_space<vmem>>, vector<32x32xbf16>
    %cst_8 = arith.constant dense<0.000000e+00> : vector<8x32xf32>
    %11 = tpu.matmul %9, %10, %cst_8 {dimension_numbers = #tpu.dot_dimension_numbers<[1], [0], [0], [1], [0, 0, 1, 1], [], []>} : vector<8x32xbf16>, vector<32x32xbf16>, vector<8x32xf32> -> vector<8x32xf32>
    %c0_9 = arith.constant 0 : index
    %c0_10 = arith.constant 0 : index
    %12 = vector.load %arg6[%c0_9, %c0_10] : memref<1x32xf32, #tpu.memory_space<vmem>>, vector<1x32xf32>
    %13 = vector.broadcast %12 : vector<1x32xf32> to vector<8x32xf32>
    %14 = arith.addf %11, %13 : vector<8x32xf32>
    %15 = arith.truncf %14 : vector<8x32xf32> to vector<8x32xbf16>
    %c0_11 = arith.constant 0 : index
    %c0_12 = arith.constant 0 : index
    %16 = vector.load %arg11[%c0_11, %c0_12] : memref<8x32xbf16, #tpu.memory_space<vmem>>, vector<8x32xbf16>
    tpu.vector_store %arg11[%c0_11, %c0_12], %15 {strides = array<i32>} : memref<8x32xbf16, #tpu.memory_space<vmem>>, vector<8x32xbf16>,
    %c0_13 = arith.constant 0 : index
    %c0_14 = arith.constant 0 : index
    %17 = vector.load %arg2[%c0_13, %c0_14] : memref<8x16xf32, #tpu.memory_space<vmem>>, vector<8x16xf32>
    %18 = arith.truncf %17 : vector<8x16xf32> to vector<8x16xbf16>
    %c0_15 = arith.constant 0 : index
    %c0_16 = arith.constant 0 : index
    %19 = vector.load %arg7[%c0_15, %c0_16] : memref<16x32xbf16, #tpu.memory_space<vmem>>, vector<16x32xbf16>
    %cst_17 = arith.constant dense<0.000000e+00> : vector<8x32xf32>
    %20 = tpu.matmul %18, %19, %cst_17 {dimension_numbers = #tpu.dot_dimension_numbers<[1], [0], [0], [1], [0, 0, 1, 1], [], []>} : vector<8x16xbf16>, vector<16x32xbf16>, vector<8x32xf32> -> vector<8x32xf32>
    %c0_18 = arith.constant 0 : index
    %c0_19 = arith.constant 0 : index
    %21 = vector.load %arg8[%c0_18, %c0_19] : memref<1x32xf32, #tpu.memory_space<vmem>>, vector<1x32xf32>
    %22 = vector.broadcast %21 : vector<1x32xf32> to vector<8x32xf32>
    %23 = arith.addf %20, %22 : vector<8x32xf32>
    %cst_20 = arith.constant 0.000000e+00 : f32
    %24 = vector.broadcast %cst_20 : f32 to vector<8x32xf32>
    %25 = arith.maximumf %23, %24 : vector<8x32xf32>
    %26 = arith.truncf %25 : vector<8x32xf32> to vector<8x32xbf16>
    %c0_21 = arith.constant 0 : index
    %c0_22 = arith.constant 0 : index
    %27 = vector.load %arg9[%c0_21, %c0_22] : memref<32x32xbf16, #tpu.memory_space<vmem>>, vector<32x32xbf16>
    %cst_23 = arith.constant dense<0.000000e+00> : vector<8x32xf32>
    %28 = tpu.matmul %26, %27, %cst_23 {dimension_numbers = #tpu.dot_dimension_numbers<[1], [0], [0], [1], [0, 0, 1, 1], [], []>} : vector<8x32xbf16>, vector<32x32xbf16>, vector<8x32xf32> -> vector<8x32xf32>
    %c0_24 = arith.constant 0 : index
    %c0_25 = arith.constant 0 : index
    %29 = vector.load %arg10[%c0_24, %c0_25] : memref<1x32xf32, #tpu.memory_space<vmem>>, vector<1x32xf32>
    %30 = vector.broadcast %29 : vector<1x32xf32> to vector<8x32xf32>
    %31 = arith.addf %28, %30 : vector<8x32xf32>
    %32 = arith.truncf %31 : vector<8x32xf32> to vector<8x32xbf16>
    %c0_26 = arith.constant 0 : index
    %c0_27 = arith.constant 0 : index
    %33 = vector.load %arg12[%c0_26, %c0_27] : memref<8x32xbf16, #tpu.memory_space<vmem>>, vector<8x32xbf16>
    tpu.vector_store %arg12[%c0_26, %c0_27], %32 {strides = array<i32>} : memref<8x32xbf16, #tpu.memory_space<vmem>>, vector<8x32xbf16>,
    return
  }
  func.func @transform_0(%arg0: i32) -> (i32, i32) {
    %c0_i32 = arith.constant 0 : i32
    %c0_i32_0 = arith.constant 0 : i32
    return %arg0, %c0_i32 : i32, i32
  }
  func.func @transform_1(%arg0: i32) -> (i32, i32) {
    %c0_i32 = arith.constant 0 : i32
    %c0_i32_0 = arith.constant 0 : i32
    return %arg0, %c0_i32 : i32, i32
  }
  func.func @transform_2(%arg0: i32) -> (i32, i32) {
    %c0_i32 = arith.constant 0 : i32
    %c0_i32_0 = arith.constant 0 : i32
    %c0_i32_1 = arith.constant 0 : i32
    return %c0_i32, %c0_i32_0 : i32, i32
  }
  func.func @transform_3(%arg0: i32) -> (i32, i32) {
    %c0_i32 = arith.constant 0 : i32
    %c0_i32_0 = arith.constant 0 : i32
    %c0_i32_1 = arith.constant 0 : i32
    return %c0_i32, %c0_i32_0 : i32, i32
  }
  func.func @transform_4(%arg0: i32) -> (i32, i32) {
    %c0_i32 = arith.constant 0 : i32
    %c0_i32_0 = arith.constant 0 : i32
    %c0_i32_1 = arith.constant 0 : i32
    return %c0_i32, %c0_i32_0 : i32, i32
  }
  func.func @transform_5(%arg0: i32) -> (i32, i32) {
    %c0_i32 = arith.constant 0 : i32
    %c0_i32_0 = arith.constant 0 : i32
    %c0_i32_1 = arith.constant 0 : i32
    return %c0_i32, %c0_i32_0 : i32, i32
  }
  func.func @transform_6(%arg0: i32) -> (i32, i32) {
    %c0_i32 = arith.constant 0 : i32
    %c0_i32_0 = arith.constant 0 : i32
    %c0_i32_1 = arith.constant 0 : i32
    return %c0_i32, %c0_i32_0 : i32, i32
  }
  func.func @transform_7(%arg0: i32) -> (i32, i32) {
    %c0_i32 = arith.constant 0 : i32
    %c0_i32_0 = arith.constant 0 : i32
    %c0_i32_1 = arith.constant 0 : i32
    return %c0_i32, %c0_i32_0 : i32, i32
  }
  func.func @transform_8(%arg0: i32) -> (i32, i32) {
    %c0_i32 = arith.constant 0 : i32
    %c0_i32_0 = arith.constant 0 : i32
    %c0_i32_1 = arith.constant 0 : i32
    return %c0_i32, %c0_i32_0 : i32, i32
  }
  func.func @transform_9(%arg0: i32) -> (i32, i32) {
    %c0_i32 = arith.constant 0 : i32
    %c0_i32_0 = arith.constant 0 : i32
    %c0_i32_1 = arith.constant 0 : i32
    return %c0_i32, %c0_i32_0 : i32, i32
  }
  func.func @transform_10(%arg0: i32) -> (i32, i32) {
    %c0_i32 = arith.constant 0 : i32
    %c0_i32_0 = arith.constant 0 : i32
    return %arg0, %c0_i32 : i32, i32
  }
  func.func @transform_11(%arg0: i32) -> (i32, i32) {
    %c0_i32 = arith.constant 0 : i32
    %c0_i32_0 = arith.constant 0 : i32
    return %arg0, %c0_i32 : i32, i32
  }
}

</mosaic_0001>

<bundles_post_ra>
// kernel: tpu_custom_call.1
= control target key start
LH: loop header
LB: loop body
LE: loop exit
PB: predicated region body
PF: predicated region fallthrough
CT: control target
= control target key end

     0   :  { %17 = vsyncpa [#allocation3], 0  ;;  %s780_s0 = inlined_call_operand.hbm [shape: f32[8,32], index: 0, kind: input, shape index: {}]   ;;  %s781_s1 = inlined_call_operand.hbm [shape: f32[8,16], index: 1, kind: input, shape index: {}]   ;;  %s782_s2 = inlined_call_operand.hbm [shape: bf16[32,32], index: 2, kind: input, shape index: {}]   ;;  %s783_s3 = inlined_call_operand.vmem [shape: f32[1,32], index: 3, kind: input, shape index: {}]   ;;  %s784_s4 = inlined_call_operand.hbm [shape: bf16[32,32], index: 4, kind: input, shape index: {}]   ;;  %s785_s5 = inlined_call_operand.vmem [shape: f32[1,32], index: 5, kind: input, shape index: {}]   ;;  %s786_s6 = inlined_call_operand.vmem [shape: bf16[16,32], index: 6, kind: input, shape index: {}]   ;;  %s787_s7 = inlined_call_operand.vmem [shape: f32[1,32], index: 7, kind: input, shape index: {}]   ;;  %s788_s8 = inlined_call_operand.vmem [shape: bf16[32,32], index: 8, kind: input, shape index: {}]   ;;  %s789_s9 = inlined_call_operand.vmem [shape: f32[1,32], index: 9, kind: input, shape index: {}]   ;;  %s790_s10 = inlined_call_operand.hbm [shape: bf16[8,32], index: 10, kind: output, shape index: {0}]   ;;  %s791_s11 = inlined_call_operand.hbm [shape: bf16[8,32], index: 11, kind: output, shape index: {1}]  }
   0x1   :  { %18 = vsyncpa [#allocation6], 0 }
   0x2   :  { %19 = vsyncpa [#allocation9], 0 }
   0x3   :  { %20 = vsyncpa [#allocation4], 0 }
   0x4   :  { %21 = vsyncpa [#allocation12], 0  ;;  %s608_s17 = smov [#allocation5]   ;;  %s609_s19 = smov [#allocation2]  }
   0x5   :  { %s38_s18 = sshll.u32 %s608_s17, 4  ;;  %s28_s20 = sshll.u32 %s609_s19, 4  ;;  %s39_s18 = int_to_ptr.vmem [resolvable:$true] %s38_s18  ;;  %s29_s20 = int_to_ptr.vmem [resolvable:$true] %s28_s20 }
   0x6   :  { %s466_s23 = scalar_lea.hbm %s781_s1, 128 }
   0x7   :  { %p467_p0 = scmp.ne.s32.totalorder %s781_s1, %s466_s23  ;;  %p470_p1 = scmp.lt.u32.totalorder %s466_s23, %s781_s1 }
   0x9   :  { %p472_p2 = pnand %p470_p1, %p467_p0 }
   0xb   :  { %475 = shalt.err (!%p472_p2)
}
   0xc   :  { %s476_s28 = scalar_lea.vmem %s39_s18, 128  ;;  %p481_p4 = scmp.lt.s32.totalorder %s39_s18, %s39_s18 }
   0xd   :  { %p477_p3 = scmp.ne.s32.totalorder %s39_s18, %s476_s28  ;;  %p482_p5 = scmp.lt.s32.totalorder %s476_s28, %s476_s28 }
   0xf   :  { %p483_p6 = por %p482_p5, %p481_p4 }
  0x11   :  { %p484_p7 = pnand %p483_p6, %p477_p3 }
  0x13   :  { %487 = shalt.err (!%p484_p7)
}
  0x14   :  { %41 = dma.hbm_to_vmem [thread:$0]  %s781_s1, 128, %s39_s18, [#allocation6]  }
  0x15   :  { %s488_s14 = scalar_lea.hbm %s780_s0, 128 }
  0x16   :  { %p489_p8 = scmp.ne.s32.totalorder %s780_s0, %s488_s14  ;;  %p492_p9 = scmp.lt.u32.totalorder %s488_s14, %s780_s0 }
  0x18   :  { %p494_p10 = pnand %p492_p9, %p489_p8 }
  0x1a   :  { %497 = shalt.err (!%p494_p10)
}
  0x1b   :  { %s498_s21 = scalar_lea.vmem %s29_s20, 128  ;;  %p503_p12 = scmp.lt.s32.totalorder %s29_s20, %s29_s20 }
  0x1c   :  { %p499_p11 = scmp.ne.s32.totalorder %s29_s20, %s498_s21  ;;  %p504_p13 = scmp.lt.s32.totalorder %s498_s21, %s498_s21 }
  0x1e   :  { %p505_p0 = por %p504_p13, %p503_p12 }
  0x20   :  { %p506_p1 = pnand %p505_p0, %p499_p11 }
  0x22   :  { %509 = shalt.err (!%p506_p1)
}
  0x23   :  { %31 = dma.hbm_to_vmem [thread:$0]  %s780_s0, 128, %s29_s20, [#allocation3]  }
  0x24   :  { %s610_s22 = smov [#allocation7]   ;;  %s510_s26 = scalar_lea.hbm %s782_s2, 256 }
  0x25   :  { %s47_s23 = sshll.u32 %s610_s22, 4  ;;  %p511_p2 = scmp.ne.s32.totalorder %s782_s2, %s510_s26  ;;  %s48_s23 = int_to_ptr.vmem [resolvable:$true] %s47_s23 }
  0x26   :  { %p514_p3 = scmp.lt.u32.totalorder %s510_s26, %s782_s2 }
  0x28   :  { %p516_p4 = pnand %p514_p3, %p511_p2 }
  0x2a   :  { %519 = shalt.err (!%p516_p4)
}
  0x2b   :  { %s520_s12 = scalar_lea.vmem %s48_s23, 256  ;;  %p525_p6 = scmp.lt.s32.totalorder %s48_s23, %s48_s23 }
  0x2c   :  { %p521_p5 = scmp.ne.s32.totalorder %s48_s23, %s520_s12  ;;  %p526_p7 = scmp.lt.s32.totalorder %s520_s12, %s520_s12 }
  0x2e   :  { %p527_p8 = por %p526_p7, %p525_p6 }
  0x30   :  { %p528_p9 = pnand %p527_p8, %p521_p5 }
  0x32   :  { %531 = shalt.err (!%p528_p9)
}
  0x33   :  { %s611_s0 = smov 64   ;;  %s612_s20 = smov 4  }
  0x34   :  { %53 = dma.hbm_to_vmem [thread:$0]  %s782_s2, 256, %s48_s23, [#allocation6], %s611_s0, %s611_s0, %s612_s20  }
  0x35   :  { %s613_s15 = smov [#allocation8]   ;;  %s532_s21 = scalar_lea.hbm %s784_s4, 256 }
  0x36   :  { %s61_s16 = sshll.u32 %s613_s15, 4  ;;  %p533_p10 = scmp.ne.s32.totalorder %s784_s4, %s532_s21  ;;  %s62_s16 = int_to_ptr.vmem [resolvable:$true] %s61_s16 }
  0x37   :  { %p536_p11 = scmp.lt.u32.totalorder %s532_s21, %s784_s4 }
  0x39   :  { %p538_p12 = pnand %p536_p11, %p533_p10 }
  0x3b   :  { %541 = shalt.err (!%p538_p12)
}
  0x3c   :  { %s542_s25 = scalar_lea.vmem %s62_s16, 256  ;;  %p547_p0 = scmp.lt.s32.totalorder %s62_s16, %s62_s16 }
  0x3d   :  { %p543_p13 = scmp.ne.s32.totalorder %s62_s16, %s542_s25  ;;  %p548_p1 = scmp.lt.s32.totalorder %s542_s25, %s542_s25 }
  0x3f   :  { %p549_p2 = por %p548_p1, %p547_p0 }
  0x41   :  { %p550_p3 = pnand %p549_p2, %p543_p13 }
  0x43   :  { %553 = shalt.err (!%p550_p3)
}
  0x44   :  { %67 = dma.hbm_to_vmem [thread:$0]  %s784_s4, 256, %s62_s16, [#allocation9], %s611_s0, %s611_s0, %s612_s20  }
  0x45   :  { %598 = dma.done.wait [#allocation3], 128  }
  0x46   :  { %599 = vsyncadd [#allocation3], 4294967168 }
  0x47   :  { %600 = dma.done.wait [#allocation6], 384  }
  0x48   :  { %601 = vsyncadd [#allocation6], 4294966912 }
  0x49   :  { %602 = dma.done.wait [#allocation9], 256  }
  0x4a   :  { %603 = vsyncadd [#allocation9], 4294967040  ;;  %v614_v0 = vmov 0.0   ;;  %vm615_vm0 = vmmov 0   ;;  %v459_v1 = vld [vmem:[#allocation7] sm:$0xff]   ;;  %v460_v2 = vld [vmem:[#allocation7 + $0x8] sm:$0xff]  }
  0x4b   :  { %419 = vmatprep.subr.bf16.mxu0 %v614_v0  ;;  %423 = vmatprep.mubr.msk.bf16.mxu0 %vm615_vm0, %v614_v0  ;;  %v91_v3 = vld [vmem:[#allocation2] sm:$0xff]  ;;  %vm116_vm1 = vcmask 261120   ;;  %v461_v5 = vld [vmem:[%s786_s6] sm:$0xff]   ;;  %v231_v6 = vld [vmem:[#allocation5] sm:$0xff]  ;;  %vm248_vm2 = vcmask 130048   ;;  %s616_s13 = smov [#allocation10]  }
  0x4c   :  { %427 = vmatprep.subr.bf16.mxu1 %v614_v0  ;;  %431 = vmatprep.mubr.msk.bf16.mxu1 %vm615_vm0, %v614_v0  ;;  %v92_v4 = vpack.c.bf16 %v91_v3, %v91_v3  ;;  %v232_v7 = vpack.c.bf16 %v231_v6, %v231_v6  ;;  %v462_v8 = vld [vmem:[#allocation8] sm:$0xff]   ;;  %v463_v9 = vld [vmem:[#allocation8 + $0x8] sm:$0xff]   ;;  %v393_v10 = vld [vmem:[%s783_s3] ss:$0 sm:$0xff]  ;;  %s368_s14 = sshll.u32 %s616_s13, 4  ;;  %vm229_vm3 = vcmask 257024   ;;  %s369_s14 = int_to_ptr.vmem [resolvable:$true] %s368_s14 }
  0x4d   :  { %420 = vmatpush3.bf16.msra.mxu0 %v459_v1  ;;  %428 = vmatpush3.bf16.msra.mxu1 %v462_v8  ;;  %v464_v17 = vld [vmem:[%s788_s8] sm:$0xff]   ;;  %v465_v21 = vld [vmem:[%s788_s8 + $0x8] sm:$0xff]   ;;  %s554_s16 = scalar_lea.vmem %s369_s14, 64  ;;  %p559_p5 = scmp.lt.s32.totalorder %s369_s14, %s369_s14 }
  0x4e   :  { %421 = vmatprep.subr.bf16.mxu0 %v614_v0  ;;  %429 = vmatprep.subr.bf16.mxu1 %v614_v0  ;;  %v401_v19 = vld [vmem:[%s787_s7] ss:$0 sm:$0xff]  ;;  %p555_p4 = scmp.ne.s32.totalorder %s369_s14, %s554_s16  ;;  %p560_p6 = scmp.lt.s32.totalorder %s554_s16, %s554_s16 }
  0x4f   :  { %v397_v28 = vld [vmem:[%s785_s5] ss:$0 sm:$0xff] }
  0x50   :  { %v404_v35 = vld [vmem:[%s789_s9] ss:$0 sm:$0xff]  ;;  %p561_p7 = por %p560_p6, %p559_p5 }
  0x51   :  { %422 = vmatpush3.bf16.msra.mxu0 %v460_v2  ;;  %430 = vmatpush3.bf16.msra.mxu1 %v463_v9 }
  0x52   :  { %435 = vmatprep.subr.bf16.mxu0 %v614_v0  ;;  %441 = vmatprep.subr.bf16.mxu1 %v614_v0  ;;  %p562_p8 = pnand %p561_p7, %p555_p4 }
  0x54   :  { %424 = vmatmul.mubr.msk.bf16.vlgmr.msra.gmra.mrb[0].mxu0 %vm116_vm1, %v92_v4 }
  0x55   :  { %436 = vmatpush3.bf16.msra.mxu0 %v461_v5  ;;  %437 = vmatprep.mubr.msk.bf16.mxu0 %vm615_vm0, %v614_v0 }
  0x5c   :  { %438 = vmatmul.mubr.msk.bf16.vlgmr.msra.gmra.mrb[4].mxu0 %vm248_vm2, %v232_v7 }
 0x127   :  { %v154_v11 = vpop.f32.mrb[0].mxu0 }
 0x128   :  { %v155_v12 = vadd.f32 %v393_v10, %v154_v11  ;;  %v425_v13 = vpop.f32.mrb[1].mxu0 }
 0x129   :  { %v157_v14 = vpop.f32.mrb[2].mxu0 }
 0x12a   :  { %v160_v15 = vmax.f32 %v155_v12, 0.0  ;;  %v426_v16 = vpop.f32.mrb[3].mxu0 }
 0x12c   :  { %v161_v18 = vpack.c.bf16 %v160_v15, %v160_v15 }
 0x12e   :  { %432 = vmatmul.mubr.msk.bf16.vlgmr.msra.gmra.mrb[0].mxu1 %vm116_vm1, %v161_v18 }
 0x12f   :  { %v286_v20 = vpop.f32.mrb[4].mxu0  ;;  %442 = vmatpush3.bf16.msra.mxu1 %v464_v17  ;;  %445 = vmatprep.mubr.msk.bf16.mxu1 %vm615_vm0, %v614_v0 }
 0x130   :  { %v287_v22 = vadd.f32 %v401_v19, %v286_v20  ;;  %v439_v23 = vpop.f32.mrb[5].mxu0  ;;  %443 = vmatprep.subr.bf16.mxu1 %v614_v0 }
 0x131   :  { %v289_v24 = vpop.f32.mrb[6].mxu0 }
 0x132   :  { %v292_v25 = vmax.f32 %v287_v22, 0.0  ;;  %v440_v26 = vpop.f32.mrb[7].mxu0 }
 0x133   :  { %444 = vmatpush3.bf16.msra.mxu1 %v465_v21 }
 0x134   :  { %v293_v27 = vpack.c.bf16 %v292_v25, %v292_v25 }
 0x136   :  { %446 = vmatmul.mubr.msk.bf16.vlgmr.msra.gmra.mrb[4].mxu1 %vm116_vm1, %v293_v27 }
 0x201   :  { %v222_v29 = vpop.f32.mrb[0].mxu1 }
 0x202   :  { %v223_v30 = vadd.f32 %v397_v28, %v222_v29  ;;  %v433_v31 = vpop.f32.mrb[1].mxu1 }
 0x203   :  { %v225_v32 = vpop.f32.mrb[2].mxu1 }
 0x204   :  { %v228_v33 = vpack.c.bf16 %v223_v30, %v223_v30  ;;  %v434_v34 = vpop.f32.mrb[3].mxu1 }
 0x206   :  { %230 = vst.msk [vmem:[#allocation10] sm:$0xf] %vm229_vm3, %v228_v33 }
 0x207   :  { %565 = shalt.err (!%p562_p8)
}
 0x208   :  { %s566_s19 = scalar_lea.hbm %s790_s10, 64 }
 0x209   :  { %p567_p9 = scmp.ne.s32.totalorder %s790_s10, %s566_s19  ;;  %p570_p10 = scmp.lt.u32.totalorder %s566_s19, %s790_s10 }
 0x20b   :  { %p572_p11 = pnand %p570_p10, %p567_p9 }
 0x20d   :  { %575 = shalt.err (!%p572_p11)
}
 0x20e   :  { %371 = dma.vmem_to_hbm [thread:$0]  %s369_s14, 64, %s790_s10, [#allocation4]   ;;  %v354_v36 = vpop.f32.mrb[4].mxu1 }
 0x20f   :  { %s617_s25 = smov [#allocation11]   ;;  %v355_v37 = vadd.f32 %v404_v35, %v354_v36  ;;  %v447_v38 = vpop.f32.mrb[5].mxu1 }
 0x210   :  { %s378_s2 = sshll.u32 %s617_s25, 4  ;;  %v357_v39 = vpop.f32.mrb[6].mxu1  ;;  %s379_s2 = int_to_ptr.vmem [resolvable:$true] %s378_s2 }
 0x211   :  { %v360_v40 = vpack.c.bf16 %v355_v37, %v355_v37  ;;  %v448_v41 = vpop.f32.mrb[7].mxu1  ;;  %s576_s23 = scalar_lea.vmem %s379_s2, 64  ;;  %p581_p13 = scmp.lt.s32.totalorder %s379_s2, %s379_s2 }
 0x212   :  { %p577_p12 = scmp.ne.s32.totalorder %s379_s2, %s576_s23  ;;  %p582_p0 = scmp.lt.s32.totalorder %s576_s23, %s576_s23 }
 0x213   :  { %361 = vst.msk [vmem:[#allocation11] sm:$0xf] %vm229_vm3, %v360_v40 }
 0x214   :  { %p583_p1 = por %p582_p0, %p581_p13 }
 0x216   :  { %p584_p2 = pnand %p583_p1, %p577_p12 }
 0x218   :  { %587 = shalt.err (!%p584_p2)
}
 0x219   :  { %s588_s26 = scalar_lea.hbm %s791_s11, 64 }
 0x21a   :  { %p589_p3 = scmp.ne.s32.totalorder %s791_s11, %s588_s26  ;;  %p592_p4 = scmp.lt.u32.totalorder %s588_s26, %s791_s11 }
 0x21c   :  { %p594_p5 = pnand %p592_p4, %p589_p3 }
 0x21e   :  { %597 = shalt.err (!%p594_p5)
}
 0x21f   :  { %381 = dma.vmem_to_hbm [thread:$0]  %s379_s2, 64, %s791_s11, [#allocation12]  }
 0x220   :  { %604 = dma.done.wait [#allocation4], 64  }
 0x221   :  { %605 = vsyncadd [#allocation4], 4294967232 }
 0x222   :  { %606 = dma.done.wait [#allocation12], 64  }
 0x223   :  { %607 = vsyncadd [#allocation12], 4294967232 }
 0x224   :  { %388 = vsyncpa [#allocation3], 1 }
 0x225   :  { %389 = vsyncpa [#allocation6], 1 }
 0x226   :  { %390 = vsyncpa [#allocation9], 1 }
 0x227   :  { %391 = vsyncpa [#allocation4], 1 }
 0x228   :  { %392 = vsyncpa [#allocation12], 1 }

</bundles_post_ra>
